<compile_context>
chip_gen: v5e
topology: v5e:2x2
jax: 0.10.0
libtpu: 0.0.40
codegen_flags: <defaults>
</compile_context>

<pallas_src>
import jax
import jax.numpy as jnp
from jax import lax
from jax.experimental import pallas as pl
from jax.experimental.pallas import tpu as pltpu

HID = 40              # hidden width of ElemNet
CHUNK_TARGET = 512    # in-kernel lane-chunk width (keeps vreg live-set small)
TILE_B_DEFAULT = 8192 # default batch tile (sweepable up to ~16384 for huge B)


def _round_up(n, m):
    return (n + m - 1) // m * m


def _plan_batch(B, tile_b_target, chunk_target):
    """Pick (num_tiles, tile_b, chunk) for the batch grid."""
    b_lane = _round_up(B, 128)
    if b_lane <= tile_b_target:
        # Small batch: use two tiles when possible so a 2-TC chip (v7x) gets
        # work on both cores; on 1-TC chips this is one extra ~0.35us step.
        num_tiles = 2 if b_lane >= 256 else 1
    else:
        num_tiles = pl.cdiv(b_lane, tile_b_target)
        if num_tiles % 2:
            num_tiles += 1            # even tile count -> balanced megacore split
    tile_b = _round_up(pl.cdiv(b_lane, num_tiles), 128)
    if tile_b >= chunk_target:
        tile_b = _round_up(tile_b, chunk_target)
        chunk = chunk_target
    else:
        chunk = tile_b
    # Never schedule a tile whose start is past the real batch: every input
    # block stays at least partially in bounds (padded tail is standard
    # Pallas uneven-division handling; no cross-batch mixing in this net).
    num_tiles = max(1, min(num_tiles, pl.cdiv(B, tile_b)))
    return num_tiles, tile_b, chunk


def _make_kernel(chunk, n_chunks):
    def kernel(x_ref, w1_ref, b1_ref, w2_ref, b2_ref, w3_ref, b3_ref, o_ref):
        # Weights / biases use constant index maps (VMEM-resident across the
        # grid); read them once, hoisted out of the chunk loop.
        w1 = w1_ref[...]            # (HID, F)   bf16
        w2 = w2_ref[...]            # (HID, HID) bf16
        w3 = w3_ref[...]            # (1, HID)   bf16
        b1 = b1_ref[...]            # (HID, 1)   f32  (kept narrow to limit vregs;
        b2 = b2_ref[...]            # (HID, 1)   f32   lane-broadcast happens in the add)
        b3 = b3_ref[...]            # (1, 1)     f32

        @pl.loop(0, n_chunks)
        def _(j):
            c0 = pl.multiple_of(j * chunk, chunk)
            # (chunk, F) f32 slab of the batch tile; bf16 cast absorbed in-kernel.
            xb = x_ref[pl.ds(c0, chunk), :].astype(jnp.bfloat16)

            # Layer 1: contract F on both operands -> (HID, chunk); batch stays
            # on the lane axis (Mosaic handles the small transpose on the XLU).
            h = lax.dot_general(w1, xb, (((1,), (1,)), ((), ())),
                                preferred_element_type=jnp.float32)
            h = h + b1
            a = pl.reciprocal(1.0 + h * h, approx=True)     # af(x)=1/(1+x^2), EUP

            # Layer 2: (HID, HID) @ (HID, chunk) -> (HID, chunk).
            h = jnp.dot(w2, a.astype(jnp.bfloat16),
                        preferred_element_type=jnp.float32)
            h = h + b2
            a = pl.reciprocal(1.0 + h * h, approx=True)

            # Layer 3 on the otherwise-idle MXU: (1, HID) @ (HID, chunk),
            # keeping the (1, chunk) output lane-dense.
            out = jnp.dot(w3, a.astype(jnp.bfloat16),
                          preferred_element_type=jnp.float32) + b3
            o_ref[:, pl.ds(c0, chunk)] = out.astype(o_ref.dtype)

    return kernel


def elemnet_forward(x, params, *, tile_b=TILE_B_DEFAULT, chunk=CHUNK_TARGET):
    """x: (B, F) float32, native layout. params: PyTorch-layout (out, in) weights."""
    B, F = x.shape

    w1 = params["w1"].astype(jnp.bfloat16)                    # (HID, F)
    w2 = params["w2"].astype(jnp.bfloat16)                    # (HID, HID)
    w3 = params["w3"].reshape(1, HID).astype(jnp.bfloat16)    # (1, HID)
    b1 = params["b1"].reshape(HID, 1).astype(jnp.float32)
    b2 = params["b2"].reshape(HID, 1).astype(jnp.float32)
    b3 = params["b3"].reshape(1, 1).astype(jnp.float32)

    if F % 16:
        # Align the contraction dim to bf16 packing (16). Only taken when F is
        # misaligned (e.g. canonical ElemNet F=86 -> 96); costs one x copy.
        f_pad = _round_up(F, 16)
        x = jnp.pad(x, ((0, 0), (0, f_pad - F)))
        w1 = jnp.pad(w1, ((0, 0), (0, f_pad - F)))
        F = f_pad

    num_tiles, tile_b, chunk = _plan_batch(B, tile_b, chunk)
    n_chunks = tile_b // chunk
    out_w = num_tiles * tile_b          # >= B, multiple of 128 -> lane-dense output

    cost = pl.CostEstimate(
        flops=2 * out_w * (HID * F + HID * HID + HID),
        transcendentals=2 * HID * out_w,
        bytes_accessed=(B * F * 4 + out_w * 4
                        + (w1.size + w2.size + w3.size) * 2
                        + (b1.size + b2.size + b3.size) * 4),
    )

    const = lambda a: pl.BlockSpec(a.shape, lambda i: (0, 0))

    out_pad = pl.pallas_call(
        _make_kernel(chunk, n_chunks),
        out_shape=jax.ShapeDtypeStruct((1, out_w), jnp.float32),
        grid=(num_tiles,),
        in_specs=[
            pl.BlockSpec((tile_b, F), lambda i: (i, 0)),   # x tile (double-buffered)
            const(w1), const(b1),                          # weights: VMEM-resident
            const(w2), const(b2),
            const(w3), const(b3),
        ],
        out_specs=pl.BlockSpec((1, tile_b), lambda i: (0, i)),  # lane-dense output
        compiler_params=pltpu.CompilerParams(
            dimension_semantics=("parallel",)),
        cost_estimate=cost,
    )(x.astype(jnp.float32), w1, b1, w2, b2, w3, b3)

    return out_pad[0, :B].reshape(B, 1)


def init_params(key, inp_num):
    """Deterministic init mimicking nn.Linear default (U(-1/sqrt(fan_in), +))."""
    ks = jax.random.split(key, 6)

    def linear(kw, kb, fan_in, fan_out):
        bound = 1.0 / jnp.sqrt(jnp.float32(fan_in))
        w = jax.random.uniform(kw, (fan_out, fan_in), jnp.float32, -bound, bound)
        b = jax.random.uniform(kb, (fan_out,), jnp.float32, -bound, bound)
        return w, b

    w1, b1 = linear(ks[0], ks[1], inp_num, HID)
    w2, b2 = linear(ks[2], ks[3], HID, HID)
    w3, b3 = linear(ks[4], ks[5], HID, 1)
    return {"w1": w1, "b1": b1, "w2": w2, "b2": b2, "w3": w3, "b3": b3}


def elemnet_ref(x, params):
    """Pure-JAX f32 reference matching the PyTorch forward."""
    af = lambda v: 1.0 / (1.0 + v ** 2)
    h = af(x @ params["w1"].T + params["b1"])
    h = af(h @ params["w2"].T + params["b2"])
    return h @ params["w3"].T + params["b3"]


if __name__ == "__main__":
    key = jax.random.PRNGKey(0)
    k_param, k_x = jax.random.split(key)

    inp_num = 16
    batch = 8

    params = init_params(k_param, inp_num)
    x = jax.random.normal(k_x, (batch, inp_num), dtype=jnp.float32)

    out = jax.block_until_ready(elemnet_forward(x, params))
    ref = elemnet_ref(x, params)

    assert out.shape == (batch, 1), out.shape
    # bf16 matmul operands + approx reciprocal -> loosened tolerance vs f32 ref.
    max_err = float(jnp.max(jnp.abs(out - ref)))
    assert jnp.allclose(out, ref, atol=4e-2, rtol=4e-2), (max_err, out, ref)

    print("KERNEL_OK")
</pallas_src>

<mosaic_0001>
module attributes {stable_mosaic.version = 11 : i64} {
  func.func @kernel(%arg0: i32, %arg1: memref<128x16xf32, #tpu.memory_space<vmem>>, %arg2: memref<40x16xbf16, #tpu.memory_space<vmem>>, %arg3: memref<40x1xf32, #tpu.memory_space<vmem>>, %arg4: memref<40x40xbf16, #tpu.memory_space<vmem>>, %arg5: memref<40x1xf32, #tpu.memory_space<vmem>>, %arg6: memref<1x40xbf16, #tpu.memory_space<vmem>>, %arg7: memref<1x1xf32, #tpu.memory_space<vmem>>, %arg8: memref<1x128xf32, #tpu.memory_space<vmem>>) attributes {dimension_semantics = [#tpu.dimension_semantics<parallel>], iteration_bounds = array<i64: 1>, scalar_prefetch = 0 : i64, scratch_operands = 0 : i64, tpu.core_type = #tpu.core_type<tc>, window_params = [{transform_indices = @transform_0, window_bounds = array<i64: 128, 16>}, {pipeline_mode = #tpu.pipeline_mode<synchronous>, transform_indices = @transform_1, window_bounds = array<i64: 40, 16>}, {pipeline_mode = #tpu.pipeline_mode<synchronous>, transform_indices = @transform_2, window_bounds = array<i64: 40, 1>}, {pipeline_mode = #tpu.pipeline_mode<synchronous>, transform_indices = @transform_3, window_bounds = array<i64: 40, 40>}, {pipeline_mode = #tpu.pipeline_mode<synchronous>, transform_indices = @transform_4, window_bounds = array<i64: 40, 1>}, {pipeline_mode = #tpu.pipeline_mode<synchronous>, transform_indices = @transform_5, window_bounds = array<i64: 1, 40>}, {pipeline_mode = #tpu.pipeline_mode<synchronous>, transform_indices = @transform_6, window_bounds = array<i64: 1, 1>}, {transform_indices = @transform_7, window_bounds = array<i64: 1, 128>}]} {
    %c0 = arith.constant 0 : index
    %c0_0 = arith.constant 0 : index
    %0 = vector.load %arg2[%c0, %c0_0] : memref<40x16xbf16, #tpu.memory_space<vmem>>, vector<40x16xbf16>
    %c0_1 = arith.constant 0 : index
    %c0_2 = arith.constant 0 : index
    %1 = vector.load %arg4[%c0_1, %c0_2] : memref<40x40xbf16, #tpu.memory_space<vmem>>, vector<40x40xbf16>
    %c0_3 = arith.constant 0 : index
    %c0_4 = arith.constant 0 : index
    %2 = vector.load %arg6[%c0_3, %c0_4] : memref<1x40xbf16, #tpu.memory_space<vmem>>, vector<1x40xbf16>
    %c0_5 = arith.constant 0 : index
    %c0_6 = arith.constant 0 : index
    %3 = vector.load %arg3[%c0_5, %c0_6] : memref<40x1xf32, #tpu.memory_space<vmem>>, vector<40x1xf32>
    %c0_7 = arith.constant 0 : index
    %c0_8 = arith.constant 0 : index
    %4 = vector.load %arg5[%c0_7, %c0_8] : memref<40x1xf32, #tpu.memory_space<vmem>>, vector<40x1xf32>
    %c0_9 = arith.constant 0 : index
    %c0_10 = arith.constant 0 : index
    %5 = vector.load %arg7[%c0_9, %c0_10] : memref<1x1xf32, #tpu.memory_space<vmem>>, vector<1x1xf32>
    %c0_i32 = arith.constant 0 : i32
    %c1_i32 = arith.constant 1 : i32
    %6 = arith.muli %c0_i32, %c1_i32 : i32
    %c0_i32_11 = arith.constant 0 : i32
    %7 = arith.addi %c0_i32_11, %6 : i32
    %c128_i32 = arith.constant 128 : i32
    %8 = arith.muli %7, %c128_i32 : i32
    %9 = tpu.assume_multiple %8, 128 : i32
    %10 = arith.index_cast %9 : i32 to index
    %c0_12 = arith.constant 0 : index
    %11 = vector.load %arg1[%10, %c0_12] : memref<128x16xf32, #tpu.memory_space<vmem>>, vector<128x16xf32>
    %12 = arith.truncf %11 : vector<128x16xf32> to vector<128x16xbf16>
    %cst = arith.constant dense<0.000000e+00> : vector<40x128xf32>
    %13 = tpu.matmul %0, %12, %cst {dimension_numbers = #tpu.dot_dimension_numbers<[1], [1], [0], [0], [0, 0, 1, 0], [], []>} : vector<40x16xbf16>, vector<128x16xbf16>, vector<40x128xf32> -> vector<40x128xf32>
    %14 = vector.broadcast %3 : vector<40x1xf32> to vector<40x128xf32>
    %15 = arith.addf %13, %14 : vector<40x128xf32>
    %16 = arith.mulf %15, %15 : vector<40x128xf32>
    %cst_13 = arith.constant 1.000000e+00 : f32
    %17 = vector.broadcast %cst_13 : f32 to vector<40x128xf32>
    %18 = arith.addf %17, %16 : vector<40x128xf32>
    %19 = tpu.reciprocal %18 {approx = true} : vector<40x128xf32> -> vector<40x128xf32>
    %20 = arith.truncf %19 : vector<40x128xf32> to vector<40x128xbf16>
    %cst_14 = arith.constant dense<0.000000e+00> : vector<40x128xf32>
    %21 = tpu.matmul %1, %20, %cst_14 {dimension_numbers = #tpu.dot_dimension_numbers<[1], [0], [0], [1], [0, 0, 1, 1], [], []>} : vector<40x40xbf16>, vector<40x128xbf16>, vector<40x128xf32> -> vector<40x128xf32>
    %22 = vector.broadcast %4 : vector<40x1xf32> to vector<40x128xf32>
    %23 = arith.addf %21, %22 : vector<40x128xf32>
    %24 = arith.mulf %23, %23 : vector<40x128xf32>
    %cst_15 = arith.constant 1.000000e+00 : f32
    %25 = vector.broadcast %cst_15 : f32 to vector<40x128xf32>
    %26 = arith.addf %25, %24 : vector<40x128xf32>
    %27 = tpu.reciprocal %26 {approx = true} : vector<40x128xf32> -> vector<40x128xf32>
    %28 = arith.truncf %27 : vector<40x128xf32> to vector<40x128xbf16>
    %cst_16 = arith.constant dense<0.000000e+00> : vector<1x128xf32>
    %29 = tpu.matmul %2, %28, %cst_16 {dimension_numbers = #tpu.dot_dimension_numbers<[1], [0], [0], [1], [0, 0, 1, 1], [], []>} : vector<1x40xbf16>, vector<40x128xbf16>, vector<1x128xf32> -> vector<1x128xf32>
    %30 = vector.broadcast %5 : vector<1x1xf32> to vector<1x128xf32>
    %31 = arith.addf %29, %30 : vector<1x128xf32>
    %c0_17 = arith.constant 0 : index
    %32 = arith.index_cast %9 : i32 to index
    %33 = vector.load %arg8[%c0_17, %32] : memref<1x128xf32, #tpu.memory_space<vmem>>, vector<1x128xf32>
    tpu.vector_store %arg8[%c0_17, %32], %31 {strides = array<i32>} : memref<1x128xf32, #tpu.memory_space<vmem>>, vector<1x128xf32>,
    %c1_i32_18 = arith.constant 1 : i32
    return
  }
  func.func @transform_0(%arg0: i32) -> (i32, i32) {
    %c0_i32 = arith.constant 0 : i32
    %c0_i32_0 = arith.constant 0 : i32
    return %arg0, %c0_i32 : i32, i32
  }
  func.func @transform_1(%arg0: i32) -> (i32, i32) {
    %c0_i32 = arith.constant 0 : i32
    %c0_i32_0 = arith.constant 0 : i32
    %c0_i32_1 = arith.constant 0 : i32
    return %c0_i32, %c0_i32_0 : i32, i32
  }
  func.func @transform_2(%arg0: i32) -> (i32, i32) {
    %c0_i32 = arith.constant 0 : i32
    %c0_i32_0 = arith.constant 0 : i32
    %c0_i32_1 = arith.constant 0 : i32
    return %c0_i32, %c0_i32_0 : i32, i32
  }
  func.func @transform_3(%arg0: i32) -> (i32, i32) {
    %c0_i32 = arith.constant 0 : i32
    %c0_i32_0 = arith.constant 0 : i32
    %c0_i32_1 = arith.constant 0 : i32
    return %c0_i32, %c0_i32_0 : i32, i32
  }
  func.func @transform_4(%arg0: i32) -> (i32, i32) {
    %c0_i32 = arith.constant 0 : i32
    %c0_i32_0 = arith.constant 0 : i32
    %c0_i32_1 = arith.constant 0 : i32
    return %c0_i32, %c0_i32_0 : i32, i32
  }
  func.func @transform_5(%arg0: i32) -> (i32, i32) {
    %c0_i32 = arith.constant 0 : i32
    %c0_i32_0 = arith.constant 0 : i32
    %c0_i32_1 = arith.constant 0 : i32
    return %c0_i32, %c0_i32_0 : i32, i32
  }
  func.func @transform_6(%arg0: i32) -> (i32, i32) {
    %c0_i32 = arith.constant 0 : i32
    %c0_i32_0 = arith.constant 0 : i32
    %c0_i32_1 = arith.constant 0 : i32
    return %c0_i32, %c0_i32_0 : i32, i32
  }
  func.func @transform_7(%arg0: i32) -> (i32, i32) {
    %c0_i32 = arith.constant 0 : i32
    %c0_i32_0 = arith.constant 0 : i32
    return %c0_i32, %arg0 : i32, i32
  }
}

</mosaic_0001>

<bundles_post_ra>
// kernel: tpu_custom_call.1
= control target key start
LH: loop header
LB: loop body
LE: loop exit
PB: predicated region body
PF: predicated region fallthrough
CT: control target
= control target key end

     0   :  { %s574_s0 = inlined_call_operand.vmem [shape: f32[8,16], index: 0, kind: input, shape index: {}]   ;;  %s575_s1 = inlined_call_operand.vmem [shape: bf16[40,16], index: 1, kind: input, shape index: {}]   ;;  %s576_s2 = inlined_call_operand.vmem [shape: f32[40,1], index: 2, kind: input, shape index: {}]   ;;  %s577_s3 = inlined_call_operand.vmem [shape: bf16[40,40], index: 3, kind: input, shape index: {}]   ;;  %s578_s4 = inlined_call_operand.vmem [shape: f32[40,1], index: 4, kind: input, shape index: {}]   ;;  %s579_s5 = inlined_call_operand.vmem [shape: bf16[1,40], index: 5, kind: input, shape index: {}]   ;;  %s580_s6 = inlined_call_operand.<no memory space> [shape: f32[1,1], index: 6, kind: input, shape index: {}]   ;;  %s581_s7 = inlined_call_operand.hbm [shape: f32[1,128], index: 7, kind: output, shape index: {}]  }
   0x1   :  { %v12_v0 = vstv %s580_s6 }
   0x2   :  { %13 = vst [vmem:[#allocation2] sm:$0x1] %v12_v0 }
   0x3   :  { %v66_v1 = vld [vmem:[%s574_s0 + $0x70] sm:$0xff]  ;;  %v67_v2 = vld [vmem:[%s574_s0 + $0x78] sm:$0xff]  ;;  %vm114_vm0 = vcmask 130048   ;;  %v64_v4 = vld [vmem:[%s574_s0 + $0x60] sm:$0xff] }
   0x4   :  { %v75_v3 = vpack.c.bf16 %v67_v2, %v66_v1  ;;  %v65_v5 = vld [vmem:[%s574_s0 + $0x68] sm:$0xff] }
   0x6   :  { %v146_v6 = vsel %vm114_vm0, %v75_v3, 0 }
   0x7   :  { %14 = vsyncpa [#allocation4], 0  ;;  %351 = vmatpush.bf16.xpose.msra.mxu3 %v146_v6  ;;  %148 = vmatpush.bf16.xpose.msra.mxu0 %v146_v6  ;;  %v74_v7 = vpack.c.bf16 %v65_v5, %v64_v4  ;;  %v62_v9 = vld [vmem:[%s574_s0 + $0x50] sm:$0xff]  ;;  %v63_v10 = vld [vmem:[%s574_s0 + $0x58] sm:$0xff]  ;;  %v410_v26 = vmov 0   ;;  %vm237_vm1 = vcmask 1043456  }
   0x8   :  { %v73_v11 = vpack.c.bf16 %v63_v10, %v62_v9  ;;  %v60_v13 = vld [vmem:[%s574_s0 + $0x40] sm:$0xff]  ;;  %v61_v14 = vld [vmem:[%s574_s0 + $0x48] sm:$0xff]  ;;  %v58_v17 = vld [vmem:[%s574_s0 + $0x30] sm:$0xff]  ;;  %361 = vset.pattern.permute.xlu0 %v410_v26  ;;  %362 = vset.pattern.permute.xlu1 %v410_v26  ;;  %vm227_vm2 = vcmask 326656   ;;  %s411_s15 = smov [#allocation3]   ;;  %s315_s19 = sshll.u32 %s581_s7, 4  ;;  %s316_s19 = int_to_ptr.hbm [resolvable:$true] %s315_s19 }
   0x9   :  { %v143_v8 = vsel %vm114_vm0, %v74_v7, 0  ;;  %v72_v15 = vpack.c.bf16 %v61_v14, %v60_v13  ;;  %v59_v18 = vld [vmem:[%s574_s0 + $0x38] sm:$0xff]  ;;  %v56_v21 = vld [vmem:[%s574_s0 + $0x20] sm:$0xff]  ;;  %v57_v22 = vld [vmem:[%s574_s0 + $0x28] sm:$0xff]  ;;  %363 = vset.pattern.permute.xlu2 %v410_v26  ;;  %s313_s16 = sshll.u32 %s411_s15, 4  ;;  %s314_s16 = int_to_ptr.vmem [resolvable:$true] %s313_s16 }
   0xa   :  { %v140_v12 = vsel %vm114_vm0, %v73_v11, 0  ;;  %v71_v19 = vpack.c.bf16 %v59_v18, %v58_v17  ;;  %v45_v23 = vld [vmem:[%s576_s2 + $0x20] sm:$0xff]  ;;  %v44_v24 = vld [vmem:[%s576_s2 + $0x18] sm:$0xff]  ;;  %v70_v25 = vpack.c.bf16 %v57_v22, %v56_v21  ;;  %v54_v28 = vld [vmem:[%s574_s0 + $0x10] sm:$0xff] }
   0xb   :  { %v137_v16 = vsel %vm114_vm0, %v72_v15, 0  ;;  %98 = vperm.xlu0 %361, %v45_v23   ;;  %93 = vperm.xlu1 %362, %v44_v24   ;;  %v55_v29 = vld [vmem:[%s574_s0 + $0x18] sm:$0xff]  ;;  %v43_v30 = vld [vmem:[%s576_s2 + $0x10] sm:$0xff]  ;;  %v52_v33 = vld [vmem:[%s574_s0] sm:$0xff] }
   0xc   :  { %v134_v20 = vsel %vm114_vm0, %v71_v19, 0  ;;  %v131_v27 = vsel %vm114_vm0, %v70_v25, 0  ;;  %v69_v31 = vpack.c.bf16 %v55_v29, %v54_v28  ;;  %v53_v34 = vld [vmem:[%s574_s0 + $0x8] sm:$0xff]  ;;  %v41_v35 = vld [vmem:[%s576_s2] sm:$0xff]  ;;  %v48_v36 = vld [vmem:[%s578_s4 + $0x10] sm:$0xff] }
   0xd   :  { %v42_v37 = vld [vmem:[%s576_s2 + $0x8] sm:$0xff]  ;;  %v68_v38 = vpack.c.bf16 %v53_v34, %v52_v33  ;;  %v49_v40 = vld [vmem:[%s578_s4 + $0x18] sm:$0xff]  ;;  %v50_v41 = vld [vmem:[%s578_s4 + $0x20] sm:$0xff] }
   0xe   :  { %v128_v32 = vsel %vm114_vm0, %v69_v31, 0  ;;  %83 = vperm.xlu2 %363, %v42_v37   ;;  %v47_v42 = vld [vmem:[%s578_s4 + $0x8] sm:$0xff]  ;;  %v347_v44 = vld [vmem:[%s575_s1] sm:$0xff]  ;;  %v34_v47 = vld [vmem:[%s575_s1 + $0x10] sm:$0xf] }
   0xf   :  { %352 = vmatpush.bf16.xpose.msra.mxu3 %v143_v8  ;;  %149 = vmatpush.bf16.xpose.msra.mxu0 %v143_v8  ;;  %v125_v39 = vsel %vm114_vm0, %v68_v38, 0  ;;  %v348_v43 = vld [vmem:[%s575_s1 + $0x8] sm:$0xff]  ;;  %v51_v45 = vld [vmem:[#allocation2] sm:$0x1]  ;;  %v110_v48 = vunpack.c.l.b16 %v34_v47  ;;  %v39_v23 = vld [vmem:[%s577_s3 + $0x10] sm:$0xf] }
  0x10   :  { %v46_v46 = vld [vmem:[%s578_s4] sm:$0xff]  ;;  %v350_v22 = vld [vmem:[%s577_s3 + $0x8] sm:$0xff]  ;;  %v223_v24 = vunpack.c.l.b16 %v39_v23 }
  0x11   :  { %v113_v49 = vpack.c.b16 %v110_v48, %v110_v48  ;;  %v349_v21 = vld [vmem:[%s577_s3] sm:$0xff] }
  0x12   :  { %v226_v25 = vpack.c.b16 %v223_v24, %v223_v24 }
  0x13   :  { %88 = vperm.xlu0 %361, %v43_v30   ;;  %78 = vperm.xlu1 %362, %v41_v35  }
  0x16   :  { %211 = vperm.xlu2 %363, %v50_v41  }
  0x17   :  { %353 = vmatpush.bf16.xpose.msra.mxu3 %v140_v12  ;;  %150 = vmatpush.bf16.xpose.msra.mxu0 %v140_v12 }
  0x1b   :  { %201 = vperm.xlu0 %361, %v48_v36   ;;  %206 = vperm.xlu1 %362, %v49_v40  }
  0x1e   :  { %191 = vperm.xlu2 %363, %v46_v46  }
  0x1f   :  { %354 = vmatpush.bf16.xpose.msra.mxu3 %v137_v16  ;;  %151 = vmatpush.bf16.xpose.msra.mxu0 %v137_v16 }
  0x23   :  { %196 = vperm.xlu0 %361, %v47_v42   ;;  %284 = vperm.xlu1 %362, %v51_v45  }
  0x27   :  { %355 = vmatpush.bf16.xpose.msra.mxu3 %v134_v20  ;;  %152 = vmatpush.bf16.xpose.msra.mxu0 %v134_v20 }
  0x2f   :  { %356 = vmatpush.bf16.xpose.msra.mxu3 %v131_v27  ;;  %153 = vmatpush.bf16.xpose.msra.mxu0 %v131_v27 }
  0x37   :  { %357 = vmatpush.bf16.xpose.msra.mxu3 %v128_v32  ;;  %154 = vmatpush.bf16.xpose.msra.mxu0 %v128_v32 }
  0x3f   :  { %358 = vmatpush.bf16.xpose.msra.mxu3 %v125_v39  ;;  %155 = vmatpush.bf16.xpose.msra.mxu0 %v125_v39 }
  0x46   :  { %333 = vmatmul.msk.bf16.vlgmr.msra.gmra.mxu3 %vm114_vm0, %v348_v43  ;;  %332 = vmatmul.msk.bf16.vlgmr.msra.gmra.mxu0 %vm114_vm0, %v347_v44 }
  0x56   :  { %334 = vmatmul.msk.bf16.gmra.mxu3 %vm114_vm0, %v113_v49 }
  0x68   :  { %v84_v61 = vpop.permute.xlu2 %83 }
  0x70   :  { %v212_v31 = vpop.permute.xlu2 %211 }
  0x78   :  { %v192_v40 = vpop.permute.xlu2 %191 }
  0x7d   :  { %v99_v51 = vpop.permute.xlu0 %98  ;;  %v94_v53 = vpop.permute.xlu1 %93 }
  0x85   :  { %v89_v56 = vpop.permute.xlu0 %88  ;;  %v79_v59 = vpop.permute.xlu1 %78 }
  0x8d   :  { %v202_v29 = vpop.permute.xlu0 %201  ;;  %v207_v32 = vpop.permute.xlu1 %206 }
  0x95   :  { %v197_v36 = vpop.permute.xlu0 %196 }
  0xc3   :  { %v157_v52 = vpop.f32.mrf.mxu0 }
  0xc4   :  { %v158_v62 = vadd.f32 %v157_v52, %v79_v59 }
  0xc6   :  { %v171_v4 = vmul.f32 %v158_v62, %v158_v62  ;;  %v285_v62 = vpop.permute.xlu1 %284 }
  0xc8   :  { %v176_v10 = vadd.f32 1.0, %v171_v4 }
  0xc9   :  { %v162_v50 = vpop.f32.mrf.mxu3 }
  0xca   :  { %v163_v58 = vadd.f32 %v162_v50, %v89_v56 }
  0xcb   :  { %v159_v57 = vpop.f32.mrf.mxu0 }
  0xcc   :  { %v160_v1 = vadd.f32 %v159_v57, %v84_v61  ;;  %v173_v3 = vmul.f32 %v163_v58, %v163_v58  ;;  %v40_v61 = vld [vmem:[%s579_s5] sm:$0x1] }
  0xce   :  { %v172_v7 = vmul.f32 %v160_v1, %v160_v1  ;;  %v178_v8 = vadd.f32 1.0, %v173_v3 }
  0xd0   :  { %v177_v11 = vadd.f32 1.0, %v172_v7 }
  0xd1   :  { %v164_v54 = vpop.f32.mrf.mxu3 }
  0xd2   :  { %v165_v55 = vadd.f32 %v164_v54, %v94_v53 }
  0xd4   :  { %v174_v0 = vmul.f32 %v165_v55, %v165_v55 }
  0xd6   :  { %v179_v6 = vadd.f32 1.0, %v174_v0 }
  0xd9   :  { %v167_v60 = vpop.f32.mrf.mxu3 }
  0xda   :  { %v168_v63 = vadd.f32 %v167_v60, %v99_v51 }
  0xdc   :  { %v175_v2 = vmul.f32 %v168_v63, %v168_v63  ;;  %v287_v63 = vperm.slane %v285_v62, 0 }
  0xde   :  { %v180_v5 = vadd.f32 1.0, %v175_v2 }
  0xe0   :  { %364 = vrcp.f32 %v180_v5 }
  0xe1   :  { %v169_v9 = vpop.f32.mrf.mxu3  ;;  %366 = vrcp.f32 %v179_v6 }
  0xe2   :  { %368 = vrcp.f32 %v178_v8 }
  0xe3   :  { %370 = vrcp.f32 %v176_v10 }
  0xe4   :  { %372 = vrcp.f32 %v177_v11 }
  0xe6   :  { %v365_v12 = vpop.eup %364 }
  0xe7   :  { %v188_v13 = vpack.c.bf16 %v365_v12, %v365_v12  ;;  %v367_v14 = vpop.eup %366 }
  0xe8   :  { %v369_v16 = vpop.eup %368 }
  0xe9   :  { %v239_v15 = vsel %vm237_vm1, %v188_v13, 0  ;;  %v371_v17 = vpop.eup %370  ;;  %v187_v18 = vpack.c.bf16 %v367_v14, %v369_v16 }
  0xea   :  { %246 = vmatpush.bf16.msra.mxu1 %v239_v15  ;;  %v373_v19 = vpop.eup %372 }
  0xeb   :  { %v186_v20 = vpack.c.bf16 %v373_v19, %v371_v17 }
  0xee   :  { %247 = vmatpush.bf16.msra.mxu1 %v187_v18 }
  0xf2   :  { %248 = vmatpush.bf16.msra.mxu1 %v186_v20 }
  0xf5   :  { %343 = vmatmul.msk.bf16.vlgmr.msra.gmra.mxu1 %vm227_vm2, %v349_v21 }
 0x105   :  { %344 = vmatmul.msk.bf16.gmra.mxu1 %vm227_vm2, %v350_v22 }
 0x115   :  { %345 = vmatmul.msk.bf16.gmra.mxu1 %vm227_vm2, %v226_v25 }
 0x172   :  { %v250_v26 = vpop.f32.mrf.mxu1 }
 0x173   :  { %v251_v42 = vadd.f32 %v250_v26, %v192_v40 }
 0x175   :  { %v264_v47 = vmul.f32 %v251_v42, %v251_v42 }
 0x177   :  { %v269_v51 = vadd.f32 1.0, %v264_v47 }
 0x17a   :  { %v252_v27 = vpop.f32.mrf.mxu1 }
 0x17b   :  { %v253_v38 = vadd.f32 %v252_v27, %v197_v36 }
 0x17d   :  { %v265_v45 = vmul.f32 %v253_v38, %v253_v38 }
 0x17f   :  { %v270_v50 = vadd.f32 1.0, %v265_v45 }
 0x182   :  { %v255_v28 = vpop.f32.mrf.mxu1 }
 0x183   :  { %v256_v34 = vadd.f32 %v255_v28, %v202_v29 }
 0x185   :  { %v266_v43 = vmul.f32 %v256_v34, %v256_v34 }
 0x187   :  { %v271_v48 = vadd.f32 1.0, %v266_v43 }
 0x18a   :  { %v257_v30 = vpop.f32.mrf.mxu1 }
 0x18b   :  { %v258_v33 = vadd.f32 %v257_v30, %v207_v32 }
 0x18d   :  { %v267_v39 = vmul.f32 %v258_v33, %v258_v33 }
 0x18f   :  { %v272_v46 = vadd.f32 1.0, %v267_v39 }
 0x192   :  { %v260_v35 = vpop.f32.mrf.mxu1 }
 0x193   :  { %v261_v37 = vadd.f32 %v260_v35, %v212_v31 }
 0x195   :  { %v268_v41 = vmul.f32 %v261_v37, %v261_v37 }
 0x197   :  { %v273_v44 = vadd.f32 1.0, %v268_v41 }
 0x199   :  { %374 = vrcp.f32 %v273_v44 }
 0x19a   :  { %v262_v49 = vpop.f32.mrf.mxu1  ;;  %376 = vrcp.f32 %v272_v46 }
 0x19b   :  { %378 = vrcp.f32 %v271_v48 }
 0x19c   :  { %380 = vrcp.f32 %v270_v50 }
 0x19d   :  { %382 = vrcp.f32 %v269_v51 }
 0x19f   :  { %v375_v52 = vpop.eup %374 }
 0x1a0   :  { %v281_v53 = vpack.c.bf16 %v375_v52, %v375_v52  ;;  %v377_v54 = vpop.eup %376 }
 0x1a1   :  { %v379_v56 = vpop.eup %378 }
 0x1a2   :  { %v292_v55 = vsel %vm237_vm1, %v281_v53, 0  ;;  %v280_v57 = vpack.c.bf16 %v377_v54, %v379_v56  ;;  %v381_v58 = vpop.eup %380 }
 0x1a3   :  { %299 = vmatpush.bf16.msra.mxu2 %v292_v55  ;;  %v383_v59 = vpop.eup %382 }
 0x1a4   :  { %v279_v60 = vpack.c.bf16 %v381_v58, %v383_v59 }
 0x1a7   :  { %300 = vmatpush.bf16.msra.mxu2 %v280_v57 }
 0x1ab   :  { %301 = vmatpush.bf16.msra.mxu2 %v279_v60 }
 0x1ae   :  { %346 = vmatmul.msk.bf16.vlgmr.msra.gmra.mxu2 %vm227_vm2, %v40_v61 }
 0x231   :  { %v303_v0 = vpop.f32.mrf.mxu2 }
 0x232   :  { %v304_v1 = vadd.f32 %v303_v0, %v287_v63 }
 0x234   :  { %307 = vst [vmem:[#allocation3] sm:$0x1] %v304_v1 }
 0x235   :  { %318 = dma.vmem_to_hbm [thread:$0]  %s314_s16, 16, %s316_s19, [#allocation4]  }
 0x239   :  { %v305_v2 = vpop.f32.mrf.mxu2 }
 0x23a   :  { %408 = dma.done.wait [#allocation4], 16  }
 0x23b   :  { %409 = vsyncadd [#allocation4], 4294967280 }
 0x23c   :  { %323 = vsyncpa [#allocation4], 1 }

</bundles_post_ra>
